<compile_context>
chip_gen: v5e
topology: v5e:2x2
jax: 0.10.0
libtpu: 0.0.40
codegen_flags: <defaults>
</compile_context>

<pallas_src>
import jax
import jax.numpy as jnp
from jax.experimental import pallas as pl
from jax.experimental.pallas import tpu as pltpu


# ---------------------------------------------------------------------------
# Kernel 1: fused QKV projection (bf16 MXU, f32 accumulation)
# ---------------------------------------------------------------------------
def qkv_proj_kernel(x_ref, w_ref, o_ref):
    # x_ref: (tm, C) bf16 ; w_ref: (C, 3*Hp) bf16 ; o_ref: (tm, 3*Hp) bf16
    o_ref[...] = jnp.dot(
        x_ref[...], w_ref[...], preferred_element_type=jnp.float32
    ).astype(o_ref.dtype)


# ---------------------------------------------------------------------------
# Kernel 2: flash-style causal attention with online softmax
# ---------------------------------------------------------------------------
def flash_attn_kernel(q_ref, k_ref, v_ref, o_ref, m_sc, l_sc, acc_sc):
    # q_ref: (1, tq, Hp) bf16 (already scaled); k_ref/v_ref: (1, tk, Hp) bf16
    # o_ref: (1, tq, Hp) f32 ; scratch: m (tq,1), l (tq,1), acc (tq,Hp) all f32
    qi = pl.program_id(1)
    ki = pl.program_id(2)
    tq = q_ref.shape[1]
    tk = k_ref.shape[1]

    @pl.when(ki == 0)
    def _init():
        m_sc[...] = jnp.full_like(m_sc, -1e30)      # finite: no inf-inf NaNs
        l_sc[...] = jnp.zeros_like(l_sc)
        acc_sc[...] = jnp.zeros_like(acc_sc)

    q_start = qi * tq
    k_start = ki * tk

    # kv-blocks entirely above the causal diagonal contribute nothing: skip.
    @pl.when(k_start <= q_start + (tq - 1))
    def _update():
        q = q_ref[0]                                 # (tq, Hp) bf16
        k = k_ref[0]                                 # (tk, Hp) bf16
        v = v_ref[0]                                 # (tk, Hp) bf16

        # q @ k^T without materializing a transpose of k.
        s = jax.lax.dot_general(
            q, k, (((1,), (1,)), ((), ())),
            preferred_element_type=jnp.float32,      # (tq, tk) f32
        )

        # Causal mask from tile indices (large finite negative, not -inf).
        row = q_start + jax.lax.broadcasted_iota(jnp.int32, (tq, tk), 0)
        col = k_start + jax.lax.broadcasted_iota(jnp.int32, (tq, tk), 1)
        s = jnp.where(col <= row, s, -1e30)

        # Online softmax (all f32).
        m_prev = m_sc[...]
        m_new = jnp.maximum(m_prev, jnp.max(s, axis=-1, keepdims=True))
        alpha = jnp.exp(m_prev - m_new)
        p = jnp.exp(s - m_new)                       # (tq, tk) f32
        l_sc[...] = alpha * l_sc[...] + jnp.sum(p, axis=-1, keepdims=True)
        acc_sc[...] = alpha * acc_sc[...] + jnp.dot(
            p.astype(jnp.bfloat16), v, preferred_element_type=jnp.float32
        )
        m_sc[...] = m_new

    @pl.when(ki == pl.num_programs(2) - 1)
    def _finalize():
        inv_l = pl.reciprocal(l_sc[...], approx=True)
        o_ref[0] = (acc_sc[...] * inv_l).astype(o_ref.dtype)


def _pick_row_tile(n):
    """Largest power-of-two row tile (<=512, >=8) that divides n, else n."""
    for c in (512, 256, 128, 64, 32, 16, 8):
        if n % c == 0:
            return c
    return n


# ---------------------------------------------------------------------------
# Wrapper
# ---------------------------------------------------------------------------
@jax.jit
def head_forward(x, wk, wq, wv):
    """x: (B, T, C) f32; wk/wq/wv: (C, H) f32 -> (B, T, H) f32."""
    B, T, C = x.shape
    H = wk.shape[1]

    # Pad head dim to a lane-dense multiple of 128.
    Hp = max(128, ((H + 127) // 128) * 128)
    pad = Hp - H
    scale = C ** (-0.5)   # module scales by n_embd**-0.5 (not head_size)

    # Fused (C, 3*Hp) weight: [k | q*scale | v], bf16 for the MXU fast path.
    wkp = jnp.pad(wk, ((0, 0), (0, pad)))
    wqp = jnp.pad(wq * scale, ((0, 0), (0, pad)))
    wvp = jnp.pad(wv, ((0, 0), (0, pad)))
    w_fused = jnp.concatenate([wkp, wqp, wvp], axis=1).astype(jnp.bfloat16)

    # --- fused QKV projection over all B*T rows ---
    BT = B * T
    x2d = x.reshape(BT, C).astype(jnp.bfloat16)
    tm = _pick_row_tile(BT)

    qkv = pl.pallas_call(
        qkv_proj_kernel,
        out_shape=jax.ShapeDtypeStruct((BT, 3 * Hp), jnp.bfloat16),
        grid=(BT // tm,),
        in_specs=[
            pl.BlockSpec((tm, C), lambda i: (i, 0)),
            pl.BlockSpec((C, 3 * Hp), lambda i: (0, 0)),
        ],
        out_specs=pl.BlockSpec((tm, 3 * Hp), lambda i: (i, 0)),
        compiler_params=pltpu.CompilerParams(dimension_semantics=("parallel",)),
    )(x2d, w_fused)

    qkv = qkv.reshape(B, T, 3 * Hp)
    k = qkv[:, :, 0 * Hp:1 * Hp]       # (B, T, Hp) bf16
    q = qkv[:, :, 1 * Hp:2 * Hp]       # (B, T, Hp) bf16, pre-scaled
    v = qkv[:, :, 2 * Hp:3 * Hp]       # (B, T, Hp) bf16

    # --- flash attention: grid = (batch, q-tiles, kv-tiles) ---
    tq = 128 if T % 128 == 0 else T
    tk = tq
    nq = T // tq
    nk = T // tk

    # Clamp kv-block index to the causal diagonal: blocks strictly above the
    # diagonal (skipped by pl.when in-kernel) map to the already-resident
    # block, so the pipeline issues no extra HBM DMA for them.
    def kv_index_map(b, qi, ki):
        return (b, jnp.minimum(qi, ki), 0)

    out_p = pl.pallas_call(
        flash_attn_kernel,
        out_shape=jax.ShapeDtypeStruct((B, T, Hp), jnp.float32),
        grid=(B, nq, nk),
        in_specs=[
            pl.BlockSpec((1, tq, Hp), lambda b, qi, ki: (b, qi, 0)),
            pl.BlockSpec((1, tk, Hp), kv_index_map),
            pl.BlockSpec((1, tk, Hp), kv_index_map),
        ],
        out_specs=pl.BlockSpec((1, tq, Hp), lambda b, qi, ki: (b, qi, 0)),
        scratch_shapes=[
            pltpu.VMEM((tq, 1), jnp.float32),    # running max
            pltpu.VMEM((tq, 1), jnp.float32),    # running denom
            pltpu.VMEM((tq, Hp), jnp.float32),   # output accumulator
        ],
        compiler_params=pltpu.CompilerParams(
            dimension_semantics=("parallel", "parallel", "arbitrary")
        ),
    )(q, k, v)

    return out_p[:, :, :H]


# ---------------------------------------------------------------------------
# Pure-JAX reference (f32) replicating the PyTorch forward (dropout off)
# ---------------------------------------------------------------------------
def head_reference(x, wk, wq, wv):
    B, T, C = x.shape
    k = x @ wk
    q = x @ wq
    v = x @ wv
    wei = jnp.einsum("bth,bsh->bts", q, k) * (C ** -0.5)
    mask = jnp.tril(jnp.ones((T, T), dtype=bool))
    wei = jnp.where(mask[None, :, :], wei, -jnp.inf)
    wei = jax.nn.softmax(wei, axis=-1)
    return jnp.einsum("bts,bsh->bth", wei, v)


if __name__ == "__main__":
    # module hyper-params implied by __init__: n_embd, head_size, block_size
    B, T, C, H = 2, 8, 32, 16   # batch, seq (block_size), n_embd, head_size

    key = jax.random.PRNGKey(0)
    kx, kk, kq, kv = jax.random.split(key, 4)
    x = jax.random.normal(kx, (B, T, C), dtype=jnp.float32)
    # deterministic Linear weights (bias=False), stored as (C, H) = W^T
    wk = jax.random.normal(kk, (C, H), dtype=jnp.float32) * (C ** -0.5)
    wq = jax.random.normal(kq, (C, H), dtype=jnp.float32) * (C ** -0.5)
    wv = jax.random.normal(kv, (C, H), dtype=jnp.float32) * (C ** -0.5)

    out = head_forward(x, wk, wq, wv)
    out = jax.block_until_ready(out)

    ref = head_reference(x, wk, wq, wv)
    assert out.shape == (B, T, H)
    # bf16 matmul operands (f32 accumulation) -> loosened tolerance vs f32 ref
    max_err = float(jnp.max(jnp.abs(out - ref)))
    assert max_err < 7.5e-2, f"max abs err {max_err}"

    print("KERNEL_OK")
</pallas_src>

<mosaic_0001>
module attributes {stable_mosaic.version = 11 : i64} {
  func.func @qkv_proj_kernel(%arg0: i32, %arg1: memref<16x32xbf16, #tpu.memory_space<vmem>>, %arg2: memref<32x384xbf16, #tpu.memory_space<vmem>>, %arg3: memref<16x384xbf16, #tpu.memory_space<vmem>>) attributes {dimension_semantics = [#tpu.dimension_semantics<parallel>], iteration_bounds = array<i64: 1>, scalar_prefetch = 0 : i64, scratch_operands = 0 : i64, tpu.core_type = #tpu.core_type<tc>, window_params = [{transform_indices = @transform_0, window_bounds = array<i64: 16, 32>}, {pipeline_mode = #tpu.pipeline_mode<synchronous>, transform_indices = @transform_1, window_bounds = array<i64: 32, 384>}, {transform_indices = @transform_2, window_bounds = array<i64: 16, 384>}]} {
    %c0 = arith.constant 0 : index
    %c0_0 = arith.constant 0 : index
    %0 = vector.load %arg1[%c0, %c0_0] : memref<16x32xbf16, #tpu.memory_space<vmem>>, vector<16x32xbf16>
    %c0_1 = arith.constant 0 : index
    %c0_2 = arith.constant 0 : index
    %1 = vector.load %arg2[%c0_1, %c0_2] : memref<32x384xbf16, #tpu.memory_space<vmem>>, vector<32x384xbf16>
    %cst = arith.constant dense<0.000000e+00> : vector<16x384xf32>
    %2 = tpu.matmul %0, %1, %cst {dimension_numbers = #tpu.dot_dimension_numbers<[1], [0], [0], [1], [0, 0, 1, 1], [], []>} : vector<16x32xbf16>, vector<32x384xbf16>, vector<16x384xf32> -> vector<16x384xf32>
    %3 = arith.truncf %2 : vector<16x384xf32> to vector<16x384xbf16>
    %c0_3 = arith.constant 0 : index
    %c0_4 = arith.constant 0 : index
    %4 = vector.load %arg3[%c0_3, %c0_4] : memref<16x384xbf16, #tpu.memory_space<vmem>>, vector<16x384xbf16>
    tpu.vector_store %arg3[%c0_3, %c0_4], %3 {strides = array<i32>} : memref<16x384xbf16, #tpu.memory_space<vmem>>, vector<16x384xbf16>,
    return
  }
  func.func @transform_0(%arg0: i32) -> (i32, i32) {
    %c0_i32 = arith.constant 0 : i32
    %c0_i32_0 = arith.constant 0 : i32
    return %arg0, %c0_i32 : i32, i32
  }
  func.func @transform_1(%arg0: i32) -> (i32, i32) {
    %c0_i32 = arith.constant 0 : i32
    %c0_i32_0 = arith.constant 0 : i32
    %c0_i32_1 = arith.constant 0 : i32
    return %c0_i32, %c0_i32_0 : i32, i32
  }
  func.func @transform_2(%arg0: i32) -> (i32, i32) {
    %c0_i32 = arith.constant 0 : i32
    %c0_i32_0 = arith.constant 0 : i32
    return %arg0, %c0_i32 : i32, i32
  }
}

module attributes {stable_mosaic.version = 11 : i64} {
  func.func @flash_attn_kernel(%arg0: i32, %arg1: i32, %arg2: i32, %arg3: memref<1x8x128xbf16, #tpu.memory_space<vmem>>, %arg4: memref<1x8x128xbf16, #tpu.memory_space<vmem>>, %arg5: memref<1x8x128xbf16, #tpu.memory_space<vmem>>, %arg6: memref<1x8x128xf32, #tpu.memory_space<vmem>>, %arg7: memref<8x1xf32, #tpu.memory_space<vmem>>, %arg8: memref<8x1xf32, #tpu.memory_space<vmem>>, %arg9: memref<8x128xf32, #tpu.memory_space<vmem>>) attributes {dimension_semantics = [#tpu.dimension_semantics<parallel>, #tpu.dimension_semantics<parallel>, #tpu.dimension_semantics<arbitrary>], iteration_bounds = array<i64: 2, 1, 1>, scalar_prefetch = 0 : i64, scratch_operands = 3 : i64, tpu.core_type = #tpu.core_type<tc>, window_params = [{transform_indices = @transform_0, window_bounds = array<i64: 1, 8, 128>}, {transform_indices = @transform_1, window_bounds = array<i64: 1, 8, 128>}, {transform_indices = @transform_2, window_bounds = array<i64: 1, 8, 128>}, {transform_indices = @transform_3, window_bounds = array<i64: 1, 8, 128>}]} {
    %c0_i32 = arith.constant 0 : i32
    %0 = arith.cmpi eq, %arg2, %c0_i32 : i32
    %1 = arith.extui %0 : i1 to i32
    %c0_i32_0 = arith.constant 0 : i32
    %2 = arith.cmpi ne, %1, %c0_i32_0 : i32
    scf.if %2 {
      %cst = arith.constant -1.000000e+30 : f32
      %12 = vector.broadcast %cst : f32 to vector<8x1xf32>
      %c0 = arith.constant 0 : index
      %c0_5 = arith.constant 0 : index
      %13 = vector.load %arg7[%c0, %c0_5] : memref<8x1xf32, #tpu.memory_space<vmem>>, vector<8x1xf32>
      tpu.vector_store %arg7[%c0, %c0_5], %12 {strides = array<i32>} : memref<8x1xf32, #tpu.memory_space<vmem>>, vector<8x1xf32>,
      %cst_6 = arith.constant 0.000000e+00 : f32
      %14 = vector.broadcast %cst_6 : f32 to vector<8x1xf32>
      %c0_7 = arith.constant 0 : index
      %c0_8 = arith.constant 0 : index
      %15 = vector.load %arg8[%c0_7, %c0_8] : memref<8x1xf32, #tpu.memory_space<vmem>>, vector<8x1xf32>
      tpu.vector_store %arg8[%c0_7, %c0_8], %14 {strides = array<i32>} : memref<8x1xf32, #tpu.memory_space<vmem>>, vector<8x1xf32>,
      %cst_9 = arith.constant 0.000000e+00 : f32
      %16 = vector.broadcast %cst_9 : f32 to vector<8x128xf32>
      %c0_10 = arith.constant 0 : index
      %c0_11 = arith.constant 0 : index
      %17 = vector.load %arg9[%c0_10, %c0_11] : memref<8x128xf32, #tpu.memory_space<vmem>>, vector<8x128xf32>
      tpu.vector_store %arg9[%c0_10, %c0_11], %16 {strides = array<i32>} : memref<8x128xf32, #tpu.memory_space<vmem>>, vector<8x128xf32>,
    } else {
    }
    %c8_i32 = arith.constant 8 : i32
    %3 = arith.muli %arg1, %c8_i32 : i32
    %c8_i32_1 = arith.constant 8 : i32
    %4 = arith.muli %arg2, %c8_i32_1 : i32
    %c7_i32 = arith.constant 7 : i32
    %5 = arith.addi %3, %c7_i32 : i32
    %6 = arith.cmpi sle, %4, %5 : i32
    %7 = arith.extui %6 : i1 to i32
    %c0_i32_2 = arith.constant 0 : i32
    %8 = arith.cmpi ne, %7, %c0_i32_2 : i32
    scf.if %8 {
      %c0 = arith.constant 0 : index
      %c0_5 = arith.constant 0 : index
      %c0_6 = arith.constant 0 : index
      %12 = vector.load %arg3[%c0, %c0_5, %c0_6] : memref<1x8x128xbf16, #tpu.memory_space<vmem>>, vector<1x8x128xbf16>
      %13 = vector.shape_cast %12 : vector<1x8x128xbf16> to vector<8x128xbf16>
      %c0_7 = arith.constant 0 : index
      %c0_8 = arith.constant 0 : index
      %c0_9 = arith.constant 0 : index
      %14 = vector.load %arg4[%c0_7, %c0_8, %c0_9] : memref<1x8x128xbf16, #tpu.memory_space<vmem>>, vector<1x8x128xbf16>
      %15 = vector.shape_cast %14 : vector<1x8x128xbf16> to vector<8x128xbf16>
      %c0_10 = arith.constant 0 : index
      %c0_11 = arith.constant 0 : index
      %c0_12 = arith.constant 0 : index
      %16 = vector.load %arg5[%c0_10, %c0_11, %c0_12] : memref<1x8x128xbf16, #tpu.memory_space<vmem>>, vector<1x8x128xbf16>
      %17 = vector.shape_cast %16 : vector<1x8x128xbf16> to vector<8x128xbf16>
      %cst = arith.constant dense<0.000000e+00> : vector<8x8xf32>
      %18 = tpu.matmul %13, %15, %cst {dimension_numbers = #tpu.dot_dimension_numbers<[1], [1], [0], [0], [0, 0, 1, 0], [], []>} : vector<8x128xbf16>, vector<8x128xbf16>, vector<8x8xf32> -> vector<8x8xf32>
      %19 = tpu.iota {dimensions = array<i32: 0>} : vector<8x8xi32>
      %20 = vector.broadcast %3 : i32 to vector<8x8xi32>
      %21 = arith.addi %20, %19 : vector<8x8xi32>
      %22 = tpu.iota {dimensions = array<i32: 1>} : vector<8x8xi32>
      %23 = vector.broadcast %4 : i32 to vector<8x8xi32>
      %24 = arith.addi %23, %22 : vector<8x8xi32>
      %25 = arith.cmpi sle, %24, %21 : vector<8x8xi32>
      %cst_13 = arith.constant -1.000000e+30 : f32
      %26 = vector.broadcast %cst_13 : f32 to vector<8x8xf32>
      %27 = arith.select %25, %18, %26 : vector<8x8xi1>, vector<8x8xf32>
      %c0_14 = arith.constant 0 : index
      %c0_15 = arith.constant 0 : index
      %28 = vector.load %arg7[%c0_14, %c0_15] : memref<8x1xf32, #tpu.memory_space<vmem>>, vector<8x1xf32>
      %cst_16 = arith.constant dense<0xFF800000> : vector<8xf32>
      %29 = vector.multi_reduction <maximumf>, %27, %cst_16 [1] : vector<8x8xf32> to vector<8xf32>
      %30 = vector.shape_cast %29 : vector<8xf32> to vector<8x1xf32>
      %31 = arith.maximumf %28, %30 : vector<8x1xf32>
      %32 = arith.subf %28, %31 : vector<8x1xf32>
      %33 = math.exp %32 : vector<8x1xf32>
      %34 = vector.broadcast %31 : vector<8x1xf32> to vector<8x8xf32>
      %35 = arith.subf %27, %34 : vector<8x8xf32>
      %36 = math.exp %35 : vector<8x8xf32>
      %c0_17 = arith.constant 0 : index
      %c0_18 = arith.constant 0 : index
      %37 = vector.load %arg8[%c0_17, %c0_18] : memref<8x1xf32, #tpu.memory_space<vmem>>, vector<8x1xf32>
      %38 = arith.mulf %33, %37 : vector<8x1xf32>
      %cst_19 = arith.constant dense<0.000000e+00> : vector<8xf32>
      %39 = vector.multi_reduction <add>, %36, %cst_19 [1] : vector<8x8xf32> to vector<8xf32>
      %40 = vector.shape_cast %39 : vector<8xf32> to vector<8x1xf32>
      %41 = arith.addf %38, %40 : vector<8x1xf32>
      %c0_20 = arith.constant 0 : index
      %c0_21 = arith.constant 0 : index
      %42 = vector.load %arg8[%c0_20, %c0_21] : memref<8x1xf32, #tpu.memory_space<vmem>>, vector<8x1xf32>
      tpu.vector_store %arg8[%c0_20, %c0_21], %41 {strides = array<i32>} : memref<8x1xf32, #tpu.memory_space<vmem>>, vector<8x1xf32>,
      %c0_22 = arith.constant 0 : index
      %c0_23 = arith.constant 0 : index
      %43 = vector.load %arg9[%c0_22, %c0_23] : memref<8x128xf32, #tpu.memory_space<vmem>>, vector<8x128xf32>
      %44 = vector.broadcast %33 : vector<8x1xf32> to vector<8x128xf32>
      %45 = arith.mulf %44, %43 : vector<8x128xf32>
      %46 = arith.truncf %36 : vector<8x8xf32> to vector<8x8xbf16>
      %cst_24 = arith.constant dense<0.000000e+00> : vector<8x128xf32>
      %47 = tpu.matmul %46, %17, %cst_24 {dimension_numbers = #tpu.dot_dimension_numbers<[1], [0], [0], [1], [0, 0, 1, 1], [], []>} : vector<8x8xbf16>, vector<8x128xbf16>, vector<8x128xf32> -> vector<8x128xf32>
      %48 = arith.addf %45, %47 : vector<8x128xf32>
      %c0_25 = arith.constant 0 : index
      %c0_26 = arith.constant 0 : index
      %49 = vector.load %arg9[%c0_25, %c0_26] : memref<8x128xf32, #tpu.memory_space<vmem>>, vector<8x128xf32>
      tpu.vector_store %arg9[%c0_25, %c0_26], %48 {strides = array<i32>} : memref<8x128xf32, #tpu.memory_space<vmem>>, vector<8x128xf32>,
      %c0_27 = arith.constant 0 : index
      %c0_28 = arith.constant 0 : index
      %50 = vector.load %arg7[%c0_27, %c0_28] : memref<8x1xf32, #tpu.memory_space<vmem>>, vector<8x1xf32>
      tpu.vector_store %arg7[%c0_27, %c0_28], %31 {strides = array<i32>} : memref<8x1xf32, #tpu.memory_space<vmem>>, vector<8x1xf32>,
    } else {
    }
    %c0_i32_3 = arith.constant 0 : i32
    %9 = arith.cmpi eq, %arg2, %c0_i32_3 : i32
    %10 = arith.extui %9 : i1 to i32
    %c0_i32_4 = arith.constant 0 : i32
    %11 = arith.cmpi ne, %10, %c0_i32_4 : i32
    scf.if %11 {
      %c0 = arith.constant 0 : index
      %c0_5 = arith.constant 0 : index
      %12 = vector.load %arg8[%c0, %c0_5] : memref<8x1xf32, #tpu.memory_space<vmem>>, vector<8x1xf32>
      %13 = tpu.reciprocal %12 {approx = true} : vector<8x1xf32> -> vector<8x1xf32>
      %c0_6 = arith.constant 0 : index
      %c0_7 = arith.constant 0 : index
      %14 = vector.load %arg9[%c0_6, %c0_7] : memref<8x128xf32, #tpu.memory_space<vmem>>, vector<8x128xf32>
      %15 = vector.broadcast %13 : vector<8x1xf32> to vector<8x128xf32>
      %16 = arith.mulf %14, %15 : vector<8x128xf32>
      %c0_8 = arith.constant 0 : index
      %c0_9 = arith.constant 0 : index
      %c0_10 = arith.constant 0 : index
      %17 = vector.load %arg6[%c0_8, %c0_9, %c0_10] : memref<1x8x128xf32, #tpu.memory_space<vmem>>, vector<1x8x128xf32>
      %18 = vector.shape_cast %17 : vector<1x8x128xf32> to vector<8x128xf32>
      %19 = vector.shape_cast %16 : vector<8x128xf32> to vector<1x8x128xf32>
      tpu.vector_store %arg6[%c0_8, %c0_9, %c0_10], %19 {strides = array<i32>} : memref<1x8x128xf32, #tpu.memory_space<vmem>>, vector<1x8x128xf32>,
    } else {
    }
    return
  }
  func.func @transform_0(%arg0: i32, %arg1: i32, %arg2: i32) -> (i32, i32, i32) {
    %c0_i32 = arith.constant 0 : i32
    %c0_i32_0 = arith.constant 0 : i32
    return %arg0, %arg1, %c0_i32 : i32, i32, i32
  }
  func.func @transform_1(%arg0: i32, %arg1: i32, %arg2: i32) -> (i32, i32, i32) {
    %0 = arith.minsi %arg1, %arg2 : i32
    %c0_i32 = arith.constant 0 : i32
    %c0_i32_0 = arith.constant 0 : i32
    return %arg0, %0, %c0_i32 : i32, i32, i32
  }
  func.func @transform_2(%arg0: i32, %arg1: i32, %arg2: i32) -> (i32, i32, i32) {
    %0 = arith.minsi %arg1, %arg2 : i32
    %c0_i32 = arith.constant 0 : i32
    %c0_i32_0 = arith.constant 0 : i32
    return %arg0, %0, %c0_i32 : i32, i32, i32
  }
  func.func @transform_3(%arg0: i32, %arg1: i32, %arg2: i32) -> (i32, i32, i32) {
    %c0_i32 = arith.constant 0 : i32
    %c0_i32_0 = arith.constant 0 : i32
    return %arg0, %arg1, %c0_i32 : i32, i32, i32
  }
}

</mosaic_0001>

<bundles_post_ra>
// kernel: head_forward.2
= control target key start
LH: loop header
LB: loop body
LE: loop exit
PB: predicated region body
PF: predicated region fallthrough
CT: control target
= control target key end

     0   :  { %vm59_vm0 = vcmask 261120   ;;  %s221_s1 = inlined_call_operand.vmem [shape: bf16[32,384], index: 1, kind: input, shape index: {}]   ;;  %s222_s0 = inlined_call_operand.vmem [shape: bf16[16,32], index: 0, kind: input, shape index: {}]   ;;  %s223_s2 = inlined_call_operand.vmem [shape: bf16[16,384], index: 2, kind: output, shape index: {}]  }
   0x1   :  { %v135_v0 = vld [vmem:[%s221_s1 + $0x18] sm:$0xf]  ;;  %v153_v1 = vld [vmem:[%s221_s1 + $0x20] sm:$0xf0]  ;;  %v152_v2 = vld [vmem:[%s221_s1 + $0x1c] sm:$0xf] }
   0x2   :  { %v136_v3 = vor.u32 %v153_v1, %v135_v0  ;;  %v137_v4 = vld [vmem:[%s221_s1 + $0x24] sm:$0xf0]  ;;  %v143_v5 = vld [vmem:[%s221_s1 + $0x20] sm:$0xf]  ;;  %v154_v6 = vld [vmem:[%s221_s1 + $0x28] sm:$0xf0] }
   0x3   :  { %v140_v7 = vor.u32 %v152_v2, %v137_v4  ;;  %v144_v8 = vor.u32 %v154_v6, %v143_v5  ;;  %v123_v9 = vld [vmem:[%s221_s1] sm:$0xf]  ;;  %v150_v10 = vld [vmem:[%s221_s1 + $0x8] sm:$0xf0]  ;;  %v149_v11 = vld [vmem:[%s221_s1 + $0x4] sm:$0xf] }
   0x4   :  { %69 = vmatpush.bf16.msra.mxu0 %v136_v3  ;;  %v124_v12 = vor.u32 %v150_v10, %v123_v9  ;;  %v125_v13 = vld [vmem:[%s221_s1 + $0xc] sm:$0xf0]  ;;  %v131_v14 = vld [vmem:[%s221_s1 + $0x8] sm:$0xf]  ;;  %v151_v15 = vld [vmem:[%s221_s1 + $0x10] sm:$0xf0] }
   0x5   :  { %83 = vmatpush.bf16.msra.mxu1 %v140_v7  ;;  %97 = vmatpush.bf16.msra.mxu2 %v144_v8  ;;  %v128_v16 = vor.u32 %v149_v11, %v125_v13  ;;  %v132_v17 = vor.u32 %v151_v15, %v131_v14  ;;  %v148_v18 = vld [vmem:[%s222_s0] sm:$0xff] }
   0x8   :  { %70 = vmatpush.bf16.msra.mxu0 %v124_v12 }
   0x9   :  { %84 = vmatpush.bf16.msra.mxu1 %v128_v16  ;;  %98 = vmatpush.bf16.msra.mxu2 %v132_v17 }
   0xb   :  { %145 = vmatmul.msk.bf16.vlgmr.msra.gmra.mxu0 %vm59_vm0, %v148_v18 }
   0xc   :  { %146 = vmatmul.msk.bf16.vlgmr.msra.gmra.mxu1 %vm59_vm0, %v148_v18  ;;  %147 = vmatmul.msk.bf16.vlgmr.msra.gmra.mxu2 %vm59_vm0, %v148_v18 }
  0x88   :  { %v72_v19 = vpop.f32.mrf.mxu0 }
  0x89   :  { %v86_v20 = vpop.f32.mrf.mxu1 }
  0x8a   :  { %v105_v21 = vpack.c.bf16 %v86_v20, %v72_v19 }
  0x8c   :  { %109 = vst [vmem:[%s223_s2] sm:$0xff] %v105_v21 }
  0x8f   :  { %v100_v22 = vpop.f32.mrf.mxu2 }
  0x90   :  { %v106_v23 = vpack.c.bf16 %v100_v22, %v100_v22  ;;  %v74_v24 = vpop.f32.mrf.mxu0 }
  0x91   :  { %v88_v25 = vpop.f32.mrf.mxu1 }
  0x92   :  { %110 = vst [vmem:[%s223_s2 + $0x8] sm:$0xf] %v106_v23  ;;  %v107_v26 = vpack.c.bf16 %v88_v25, %v74_v24 }
  0x94   :  { %111 = vst [vmem:[%s223_s2 + $0xc] sm:$0xff] %v107_v26 }
  0x97   :  { %v102_v27 = vpop.f32.mrf.mxu2 }
  0x98   :  { %v108_v28 = vpack.c.bf16 %v102_v27, %v102_v27 }
  0x9a   :  { %112 = vst [vmem:[%s223_s2 + $0x14] sm:$0xf] %v108_v28 }

// kernel: head_forward.3
= control target key start
LH: loop header
LB: loop body
LE: loop exit
PB: predicated region body
PF: predicated region fallthrough
CT: control target
= control target key end

     0   :  { %8 = vsyncpa [#allocation6], 0  ;;  %s813_s0 = inlined_call_operand.vmem [shape: bf16[2,8,128], index: 0, kind: input, shape index: {}]   ;;  %s814_s1 = inlined_call_operand.vmem [shape: bf16[2,8,128], index: 1, kind: input, shape index: {}]   ;;  %s815_s2 = inlined_call_operand.vmem [shape: bf16[2,8,128], index: 2, kind: input, shape index: {}]   ;;  %s816_s3 = inlined_call_operand.hbm [shape: f32[2,8,128], index: 3, kind: output, shape index: {}]  }
   0x1   :  { %10 = vsyncpa [#allocation6 + $0x1], 0  ;;  %s698_s12 = smov 0   ;;  %s700_s13 = smov 0  }
   0x2   :  { %s702_s14 = smov 0   ;;  %s704_s15 = smov 0  }
   0x3   :  { %s706_s16 = smov 0   ;;  %s708_s17 = smov 0  }
   0x4 LB: > { %s514_s18 = sadd.s32 4294967295, %s673_s17   ;;  %s515_s19 = sadd.s32 4294967294, %s673_s17   ;;  %s673_s17 = sphi %s708_s17, %s16_s17   ;;  %s669_s16 = sphi %s706_s16, %s823_s16   ;;  %s665_s15 = sphi %s704_s15, %s822_s15   ;;  %s661_s14 = sphi %s702_s14, %s821_s14   ;;  %s657_s13 = sphi %s700_s13, %s820_s13   ;;  %s653_s12 = sphi %s698_s12, %s819_s12  }
   0x5   : > { %s35_s20 = sadd.s32 1, %s669_s16  ;;  %s136_s21 = sadd.s32 1, %s661_s14 }
   0x6   : > { %p37_p0 = scmp.ge.s32.totalorder %s35_s20, 2  ;;  %p146_p1 = scmp.ne.s32.totalorder %s661_s14, %s657_s13 }
   0x7   : > { %p147_p2 = scmp.eq.s32.totalorder %s514_s18, 1  ;;  %p152_p3 = scmp.ne.s32.totalorder %s657_s13, %s653_s12 }
   0x8   : > { %s825_s20 = smov (%p37_p0, %s35_s20), 0  ;;  %p153_p5 = scmp.eq.s32.totalorder %s515_s19, 1 }
   0x9   : > { %p738_p4 = por %p147_p2, %p146_p1  ;;  %s131_s23 = ssub.s32 %s669_s16, %s825_s20 }
   0xa   : > { %p518_p6 = scmp.ge.s32.totalorder %s673_s17, 1  ;;  %p134_p7 = scmp.eq.s32.totalorder %s131_s23, 0 }
   0xb   : > { %p745_p8 = por %p153_p5, %p152_p3  ;;  %p209_p9 = scmp.lt.s32.totalorder %s673_s17, 3 }
   0xc   : > { %s751_s25 = scalar_select %p134_p7, %s661_s14, %s136_s21  }
   0xd   : > { %p210_p10 = pnand %p518_p6, %p209_p9 }
   0xe   : > { %p253_p11 = scmp.lt.s32.totalorder (!%p210_p10), %s665_s15, 1  ;;  %s250_s10 = sand.u32 (!%p210_p10), 1, %s657_s13  }
   0xf   : > { %213 = sbr.rel (%p210_p10) target bundleno = 634 (0x27a), region = 32  ;;  %s519_s11 = sshll.u32 (!%p210_p10), %s250_s10, 3 }
  0x10   : > { %s525_s18 = sshll.u32 (!%p210_p10), %s665_s15, 3  ;;  %s394_s29 = scalar_lea.sflag (!%p210_p10), [#allocation6], %s250_s10 }
  0x11   : > { %s405_s23 = scalar_lea.hbm (!%p210_p10), %s816_s3, %s525_s18 }
  0x12   : > { %s409_s28 = sshll.u32 (!%p210_p10), %s405_s23, 4  ;;  %s410_s28 = int_to_ptr.hbm [resolvable:$true] %s409_s28 }
  0x14   : > { %s254_s26 = scalar_select %p253_p11, %s665_s15, 1  ;;  %vm287_vm0 = vcmask 7168   ;;  %v675_v2 = vmov -1e+30   ;;  %v314_v3 = vlaneseq  ;;  %vm325_vm2 = vcmask 64512  }
  0x15   : > { %288 = vst.msk [vmem:[#allocation2] sm:$0xff] %vm287_vm0, %v675_v2  ;;  %v676_v10 = vmov 0   ;;  %v677_v11 = vmov 0.0   ;;  %vm360_vm3 = vcmask 1043456  }
  0x16   : > { %s755_s27 = sshll.u32 %s254_s26, 2  ;;  %v315_v4 = vshrl.u32 %v314_v3, 7  ;;  %v319_v5 = vand.u32 127, %v314_v3  ;;  %586 = vset.pattern.permute.xlu0 %v676_v10  ;;  %587 = vset.pattern.permute.xlu1 %v676_v10  ;;  %289 = vst.msk [vmem:[#allocation3] sm:$0xff] %vm287_vm0, %v677_v11  ;;  %s252_s26 = scalar_lea.vmem [#allocation5], %s519_s11 }
  0x17   : > { %s268_s30 = scalar_lea.vmem %s814_s1, %s755_s27  ;;  %s259_s6 = scalar_lea.vmem %s813_s0, %s755_s27  ;;  %588 = vset.pattern.permute.xlu2 %v676_v10 }
  0x18   : > { %v299_v0 = vld [vmem:[%s268_s30] sm:$0xf]  ;;  %vm322_vm1 = vcmp.le.s32.totalorder %v319_v5, %v315_v4  ;;  %s279_s9 = scalar_lea.vmem %s815_s2, %s755_s27  ;;  %s407_s27 = sshll.u32 %s252_s26, 4  ;;  %s408_s27 = int_to_ptr.vmem [resolvable:$true] %s407_s27 }
  0x19   : > { %308 = vmatpush.bf16.xpose.msra.mxu0 %v299_v0  ;;  %v298_v1 = vld [vmem:[%s259_s6] sm:$0xf]  ;;  %s609_s30 = sshra.s32 %s410_s28, 4  ;;  %s615_s6 = scalar_lea.hbm %s816_s3, 16  ;;  %s610_s30 = int_to_ptr.hbm [resolvable:$true] %s609_s30 }
  0x1a   : > { %v300_v16 = vld [vmem:[%s279_s9] sm:$0xf]  ;;  %s611_s4 = scalar_lea.hbm %s610_s30, 8  ;;  %p616_p1 = scmp.lt.s32.totalorder %s610_s30, %s816_s3 }
  0x1b   : > { %v362_v17 = vsel %vm360_vm3, %v300_v16, 0  ;;  %p612_p12 = scmp.ne.s32.totalorder %s610_s30, %s611_s4  ;;  %p617_p2 = scmp.lt.s32.totalorder %s615_s6, %s611_s4 }
  0x1c   : > { %v324_v12 = vld [vmem:[#allocation2] sm:$0xff]  ;;  %371 = vmatpush.bf16.msra.mxu1 %v362_v17 }
  0x1d   : > { %v341_v26 = vld [vmem:[#allocation3] sm:$0xff]  ;;  %p613_p13 = pnand %p612_p12, %p738_p4  ;;  %p618_p3 = por %p617_p2, %p616_p1 }
  0x1f   : > { %p614_p0 = pneg %p613_p13 }
  0x20   : > { %309 = vmatmul.bf16.vlgmr.msra.gmra.mxu0 %v298_v1 }
  0x21   : > { %p619_p5 = pnand %p618_p3, %p614_p0 }
  0x9d   : > { %v310_v6 = vpop.f32.mrf.mxu0 }
  0x9e   : > { %v323_v7 = vsel %vm322_vm1, %v310_v6, -1e+30 }
  0x9f   : > { %v326_v8 = vsel %vm325_vm2, %v323_v7, -inf }
  0xa0   : > { %327 = vmax.xlane.f32.xlu0 %v326_v8 }
  0xa5   : > { %v312_v9 = vpop.f32.mrf.mxu0 }
 0x113   : > { %v328_v13 = vpop.xlane.xlu0 %327 }
 0x114   : > { %v329_v14 = vmax.f32 %v324_v12, %v328_v13 }
 0x116   : > { %v330_v15 = vsub.f32 %v324_v12, %v329_v14  ;;  %379 = vst.msk [vmem:[#allocation2] sm:$0xff] %vm287_vm0, %v329_v14  ;;  %335 = vperm.xlu0 %586, %v329_v14  }
 0x118   : > { %v331_v24 = vmul.f32 1.442695, %v330_v15 }
 0x188   : > { %v336_v18 = vpop.permute.xlu0 %335 }
 0x189   : > { %v338_v19 = vsub.f32 %v323_v7, %v336_v18 }
 0x18b   : > { %v339_v20 = vmul.f32 1.442695, %v338_v19 }
 0x18d   : > { %589 = vpow2.f32 %v339_v20 }
 0x18e   : > { %591 = vpow2.f32 %v331_v24 }
 0x193   : > { %v590_v21 = vpop.eup %589 }
 0x194   : > { %v343_v22 = vsel %vm325_vm2, %v590_v21, 0.0  ;;  %v356_v23 = vpack.c.bf16 %v590_v21, %v590_v21  ;;  %v592_v25 = vpop.eup %591 }
 0x195   : > { %344 = vadd.xlane.f32.xlu1 %v343_v22  ;;  %v342_v27 = vmul.f32 %v592_v25, %v341_v26 }
 0x196   : > { %523 = vmatmul.msk.bf16.vlgmr.msra.gmra.mxu1 %vm325_vm2, %v356_v23 }
 0x1ae   : > { %352 = vperm.xlu1 %587, %v592_v25  }
 0x208   : > { %v345_v28 = vpop.xlane.xlu1 %344 }
 0x209   : > { %v346_v29 = vadd.f32 %v345_v28, %v342_v27 }
 0x20b   : > { %348 = vst.msk [vmem:[#allocation3] sm:$0xff] %vm287_vm0, %v346_v29 }
 0x212   : > { %v383_v30 = vld [vmem:[#allocation3] sm:$0xff] }
 0x213   : > { %v373_v31 = vpop.f32.mrf.mxu1  ;;  %593 = vrcp.f32 %v383_v30 }
 0x219   : > { %v594_v32 = vpop.eup %593 }
 0x21a   : > { %388 = vperm.xlu2 %588, %v594_v32  }
 0x21b   : > { %v375_v33 = vpop.f32.mrf.mxu1 }
 0x220   : > { %v353_v34 = vpop.permute.xlu1 %352 }
 0x221   : > { %v355_v35 = vmul.f32 0.0, %v353_v34 }
 0x223   : > { %v377_v36 = vadd.f32 %v373_v31, %v355_v35 }
 0x274   : > { %v389_v37 = vpop.permute.xlu2 %388 }
 0x275   : > { %v391_v38 = vmul.f32 %v389_v37, %v377_v36 }
 0x277   : > { %392 = vst [vmem:[%s252_s26] sm:$0xff] %v391_v38 }
 0x278   : > { %622 = shalt.err (!%p619_p5)
}
 0x279   : > { %528 = dma.vmem_to_hbm [thread:$0]  (%p738_p4), %s408_s27, 128, %s410_s28, %s394_s29  }
 0x27a PF: > { %p534_p6 = scmp.ge.s32.totalorder %s673_s17, 2  ;;  %s421_s9 = sand.u32 1, %s653_s12  }
 0x27b   : > { %s422_s10 = scalar_lea.sflag [#allocation6], %s421_s9 }
 0x27c   : > { %p531_p7 = pnand %p534_p6, %p745_p8 }
 0x27e   : > { %p532_p9 = pneg %p531_p7 }
 0x280   : > { %648 = dma.done.wait (%p532_p9), %s422_s10, 128  }
 0x281   : > { %650 = vsyncadd (%p532_p9), %s422_s10, 4294967168  ;;  %s16_s17 = sadd.s32 1, %s673_s17   ;;  %s819_s12 = smov %s657_s13 }
 0x282   : > { %p13_p10 = scmp.ge.s32.totalorder %s16_s17, 4   ;;  %s820_s13 = smov %s661_s14 }
 0x283   : > { %s821_s14 = smov %s751_s25  ;;  %s822_s15 = smov %s669_s16 }
 0x284   : > { %s823_s16 = smov %s825_s20  ;;  %15 = sbr.rel (!%p13_p10) target bundleno = 4 (0x4), region = 85 }
 0x289   :  { %428 = vsyncpa [#allocation6], 1 }
 0x28a   :  { %430 = vsyncpa [#allocation6 + $0x1], 1 }

</bundles_post_ra>
